<compile_context>
chip_gen: v7x
topology: tpu7x:2x2x1
jax: 0.10.0
libtpu: 0.0.40
codegen_flags: <defaults>
</compile_context>

<pallas_src>
import functools

import jax
import jax.numpy as jnp
from jax.experimental import pallas as pl
from jax.experimental.pallas import tpu as pltpu


def _mlp_kernel(*refs, num_linear):
    """refs = (x_ref, W0, b0, W1, b1, ..., W_{L-1}, b_{L-1}, out_ref).

    Layout: activations are [features, batch_tile] (batch on lanes).
      hidden layers:  W_i  bf16 [out, in],   b_i  f32 [out, 1]
      last layer:     w    f32  [hidden, 1], b    f32 [1, 1]
    """
    x_ref = refs[0]
    out_ref = refs[-1]

    h = x_ref[...].astype(jnp.float32)                 # [in, bt]

    # Hidden layers: bf16 MXU matmul, f32 accumulate, bias + ReLU in f32.
    for i in range(num_linear - 1):
        w = refs[1 + 2 * i][...]                       # bf16 [out, in]
        b = refs[2 + 2 * i][...]                       # f32  [out, 1] -> lanes bcast
        h = jnp.dot(w, h.astype(jnp.bfloat16),
                    preferred_element_type=jnp.float32)
        h = jnp.maximum(h + b, 0.0)                    # [out, bt]

    # Final Linear(hidden, 1): VPU multiply + sublane reduce (skip N=1 MXU pass).
    w_last = refs[1 + 2 * (num_linear - 1)][...]       # f32 [hidden, 1]
    b_last = refs[2 + 2 * (num_linear - 1)][...]       # f32 [1, 1]
    logits = jnp.sum(h * w_last, axis=0, keepdims=True) + b_last   # [1, bt]
    out_ref[...] = jax.nn.sigmoid(logits).astype(out_ref.dtype)


def dnn_forward(x, params, *, batch_tile=256):
    """Forward pass of DNN.

    x: [B, input_size] float32 (same layout as torch.nn.Linear input).
    params: list of (W [out_features, in_features], b [out_features]) in
            PyTorch layout, matching
            Linear(in, hidden), Linear(hidden, hidden) * (num_layers-1),
            Linear(hidden, 1).
    Returns [B, 1] float32 (sigmoid output).
    """
    assert batch_tile % 128 == 0, "batch_tile must be a multiple of 128 (lane width)"
    B, in_size = x.shape
    num_linear = len(params)
    assert num_linear >= 2

    # Kernel-side parameter layout (see _mlp_kernel docstring).
    ops = []
    for i, (w, b) in enumerate(params):
        if i < num_linear - 1:
            ops.append(jnp.asarray(w, jnp.bfloat16))                   # [out, in]
            ops.append(jnp.asarray(b, jnp.float32).reshape(-1, 1))     # [out, 1]
        else:
            ops.append(jnp.asarray(w, jnp.float32).reshape(-1, 1))     # [hidden, 1]
            ops.append(jnp.asarray(b, jnp.float32).reshape(1, 1))      # [1, 1]

    # Batch on the lane axis; pad to a multiple of batch_tile (masked tail).
    grid_b = pl.cdiv(B, batch_tile)
    b_padded = grid_b * batch_tile
    x_t = jnp.asarray(x, jnp.float32).T                                # [in, B]
    if b_padded != B:
        x_t = jnp.pad(x_t, ((0, 0), (0, b_padded - B)))

    in_specs = [pl.BlockSpec((in_size, batch_tile), lambda i: (0, i))]
    for op in ops:
        # Full-array blocks, re-used by every grid step.
        in_specs.append(pl.BlockSpec(op.shape, lambda i: (0, 0)))

    out_specs = pl.BlockSpec((1, batch_tile), lambda i: (0, i))        # lane-dense
    out_shape = jax.ShapeDtypeStruct((1, b_padded), jnp.float32)

    kernel = functools.partial(_mlp_kernel, num_linear=num_linear)

    y = pl.pallas_call(
        kernel,
        out_shape=out_shape,
        grid_spec=pltpu.PrefetchScalarGridSpec(
            num_scalar_prefetch=0,
            grid=(grid_b,),
            in_specs=in_specs,
            out_specs=out_specs,
        ),
        compiler_params=pltpu.CompilerParams(
            dimension_semantics=("parallel",),
            vmem_limit_bytes=64 * 1024 * 1024,
        ),
    )(x_t, *ops)

    return y[0, :B].reshape(B, 1)


def init_dnn_params(key, input_size, num_layers, hidden_size):
    """PyTorch-style uniform(-1/sqrt(fan_in), +1/sqrt(fan_in)) init.

    Returns list of (W [out, in], b [out]) in PyTorch layout for
      Linear(input_size, hidden), [Linear(hidden, hidden)]*(num_layers-1),
      Linear(hidden, 1).
    """
    dims = [input_size] + [hidden_size] * num_layers + [1]
    params = []
    for fan_in, fan_out in zip(dims[:-1], dims[1:]):
        key, kw, kb = jax.random.split(key, 3)
        bound = 1.0 / (fan_in ** 0.5)
        w = jax.random.uniform(kw, (fan_out, fan_in), jnp.float32, -bound, bound)
        b = jax.random.uniform(kb, (fan_out,), jnp.float32, -bound, bound)
        params.append((w, b))
    return params


def dnn_reference(x, params, *, match_kernel=False):
    """Pure-JAX reference.  match_kernel=True mimics the kernel's bf16 matmul
    operands + f32 accumulation and the f32 elementwise final layer."""
    h = jnp.asarray(x, jnp.float32)
    num_linear = len(params)
    for i, (w, b) in enumerate(params):
        if i < num_linear - 1:
            if match_kernel:
                h = jnp.dot(h.astype(jnp.bfloat16), w.T.astype(jnp.bfloat16),
                            preferred_element_type=jnp.float32) + b[None, :]
            else:
                h = h @ w.T + b[None, :]
            h = jnp.maximum(h, 0.0)
        else:
            if match_kernel:
                h = jnp.sum(h * w[0][None, :], axis=-1, keepdims=True) + b[None, :]
            else:
                h = h @ w.T + b[None, :]
            h = jax.nn.sigmoid(h)
    return h


if __name__ == "__main__":
    # Shapes consistent with DNN(input_size, num_layers, hidden_size).
    input_size, num_layers, hidden_size = 16, 3, 32
    batch = 512          # 2 grid steps at batch_tile=256 -> both v7x TCs busy
    batch_tile = 256

    key = jax.random.PRNGKey(0)
    key, kx = jax.random.split(key)
    x = jax.random.normal(kx, (batch, input_size), jnp.float32)
    params = init_dnn_params(key, input_size, num_layers, hidden_size)

    # Divisible batch.
    out = jax.block_until_ready(dnn_forward(x, params, batch_tile=batch_tile))
    assert out.shape == (batch, 1), out.shape

    ref_matched = dnn_reference(x, params, match_kernel=True)
    ref_f32 = dnn_reference(x, params, match_kernel=False)
    err_matched = float(jnp.max(jnp.abs(out - ref_matched)))
    err_f32 = float(jnp.max(jnp.abs(out - ref_f32)))
    assert err_matched < 1e-4, f"matched-ref max abs err {err_matched}"
    assert err_f32 < 3e-2, f"f32-ref max abs err {err_f32}"

    # Non-divisible batch (exercises the cdiv + zero-padded tail path).
    x_ragged = x[:300]
    out_r = jax.block_until_ready(dnn_forward(x_ragged, params, batch_tile=batch_tile))
    ref_r = dnn_reference(x_ragged, params, match_kernel=True)
    assert out_r.shape == (300, 1), out_r.shape
    err_r = float(jnp.max(jnp.abs(out_r - ref_r)))
    assert err_r < 1e-4, f"ragged max abs err {err_r}"

    print("KERNEL_OK")
</pallas_src>

<mosaic_0001>
module attributes {stable_mosaic.version = 11 : i64} {
  func.func @_mlp_kernel(%arg0: i32, %arg1: memref<16x256xf32, #tpu.memory_space<vmem>>, %arg2: memref<32x16xbf16, #tpu.memory_space<vmem>>, %arg3: memref<32x1xf32, #tpu.memory_space<vmem>>, %arg4: memref<32x32xbf16, #tpu.memory_space<vmem>>, %arg5: memref<32x1xf32, #tpu.memory_space<vmem>>, %arg6: memref<32x32xbf16, #tpu.memory_space<vmem>>, %arg7: memref<32x1xf32, #tpu.memory_space<vmem>>, %arg8: memref<32x1xf32, #tpu.memory_space<vmem>>, %arg9: memref<1x1xf32, #tpu.memory_space<vmem>>, %arg10: memref<1x256xf32, #tpu.memory_space<vmem>>) attributes {dimension_semantics = [#tpu.dimension_semantics<parallel>], iteration_bounds = array<i64: 2>, scalar_prefetch = 0 : i64, scratch_operands = 0 : i64, tpu.core_type = #tpu.core_type<tc>, window_params = [{transform_indices = @transform_0, window_bounds = array<i64: 16, 256>}, {pipeline_mode = #tpu.pipeline_mode<synchronous>, transform_indices = @transform_1, window_bounds = array<i64: 32, 16>}, {pipeline_mode = #tpu.pipeline_mode<synchronous>, transform_indices = @transform_2, window_bounds = array<i64: 32, 1>}, {pipeline_mode = #tpu.pipeline_mode<synchronous>, transform_indices = @transform_3, window_bounds = array<i64: 32, 32>}, {pipeline_mode = #tpu.pipeline_mode<synchronous>, transform_indices = @transform_4, window_bounds = array<i64: 32, 1>}, {pipeline_mode = #tpu.pipeline_mode<synchronous>, transform_indices = @transform_5, window_bounds = array<i64: 32, 32>}, {pipeline_mode = #tpu.pipeline_mode<synchronous>, transform_indices = @transform_6, window_bounds = array<i64: 32, 1>}, {pipeline_mode = #tpu.pipeline_mode<synchronous>, transform_indices = @transform_7, window_bounds = array<i64: 32, 1>}, {pipeline_mode = #tpu.pipeline_mode<synchronous>, transform_indices = @transform_8, window_bounds = array<i64: 1, 1>}, {transform_indices = @transform_9, window_bounds = array<i64: 1, 256>}]} {
    %c0 = arith.constant 0 : index
    %c0_0 = arith.constant 0 : index
    %0 = vector.load %arg1[%c0, %c0_0] : memref<16x256xf32, #tpu.memory_space<vmem>>, vector<16x256xf32>
    %c0_1 = arith.constant 0 : index
    %c0_2 = arith.constant 0 : index
    %1 = vector.load %arg2[%c0_1, %c0_2] : memref<32x16xbf16, #tpu.memory_space<vmem>>, vector<32x16xbf16>
    %c0_3 = arith.constant 0 : index
    %c0_4 = arith.constant 0 : index
    %2 = vector.load %arg3[%c0_3, %c0_4] : memref<32x1xf32, #tpu.memory_space<vmem>>, vector<32x1xf32>
    %3 = arith.truncf %0 : vector<16x256xf32> to vector<16x256xbf16>
    %cst = arith.constant dense<0.000000e+00> : vector<32x256xf32>
    %4 = tpu.matmul %1, %3, %cst {dimension_numbers = #tpu.dot_dimension_numbers<[1], [0], [0], [1], [0, 0, 1, 1], [], []>} : vector<32x16xbf16>, vector<16x256xbf16>, vector<32x256xf32> -> vector<32x256xf32>
    %5 = vector.broadcast %2 : vector<32x1xf32> to vector<32x256xf32>
    %6 = arith.addf %4, %5 : vector<32x256xf32>
    %cst_5 = arith.constant 0.000000e+00 : f32
    %7 = vector.broadcast %cst_5 : f32 to vector<32x256xf32>
    %8 = arith.maximumf %6, %7 : vector<32x256xf32>
    %c0_6 = arith.constant 0 : index
    %c0_7 = arith.constant 0 : index
    %9 = vector.load %arg4[%c0_6, %c0_7] : memref<32x32xbf16, #tpu.memory_space<vmem>>, vector<32x32xbf16>
    %c0_8 = arith.constant 0 : index
    %c0_9 = arith.constant 0 : index
    %10 = vector.load %arg5[%c0_8, %c0_9] : memref<32x1xf32, #tpu.memory_space<vmem>>, vector<32x1xf32>
    %11 = arith.truncf %8 : vector<32x256xf32> to vector<32x256xbf16>
    %cst_10 = arith.constant dense<0.000000e+00> : vector<32x256xf32>
    %12 = tpu.matmul %9, %11, %cst_10 {dimension_numbers = #tpu.dot_dimension_numbers<[1], [0], [0], [1], [0, 0, 1, 1], [], []>} : vector<32x32xbf16>, vector<32x256xbf16>, vector<32x256xf32> -> vector<32x256xf32>
    %13 = vector.broadcast %10 : vector<32x1xf32> to vector<32x256xf32>
    %14 = arith.addf %12, %13 : vector<32x256xf32>
    %cst_11 = arith.constant 0.000000e+00 : f32
    %15 = vector.broadcast %cst_11 : f32 to vector<32x256xf32>
    %16 = arith.maximumf %14, %15 : vector<32x256xf32>
    %c0_12 = arith.constant 0 : index
    %c0_13 = arith.constant 0 : index
    %17 = vector.load %arg6[%c0_12, %c0_13] : memref<32x32xbf16, #tpu.memory_space<vmem>>, vector<32x32xbf16>
    %c0_14 = arith.constant 0 : index
    %c0_15 = arith.constant 0 : index
    %18 = vector.load %arg7[%c0_14, %c0_15] : memref<32x1xf32, #tpu.memory_space<vmem>>, vector<32x1xf32>
    %19 = arith.truncf %16 : vector<32x256xf32> to vector<32x256xbf16>
    %cst_16 = arith.constant dense<0.000000e+00> : vector<32x256xf32>
    %20 = tpu.matmul %17, %19, %cst_16 {dimension_numbers = #tpu.dot_dimension_numbers<[1], [0], [0], [1], [0, 0, 1, 1], [], []>} : vector<32x32xbf16>, vector<32x256xbf16>, vector<32x256xf32> -> vector<32x256xf32>
    %21 = vector.broadcast %18 : vector<32x1xf32> to vector<32x256xf32>
    %22 = arith.addf %20, %21 : vector<32x256xf32>
    %cst_17 = arith.constant 0.000000e+00 : f32
    %23 = vector.broadcast %cst_17 : f32 to vector<32x256xf32>
    %24 = arith.maximumf %22, %23 : vector<32x256xf32>
    %c0_18 = arith.constant 0 : index
    %c0_19 = arith.constant 0 : index
    %25 = vector.load %arg8[%c0_18, %c0_19] : memref<32x1xf32, #tpu.memory_space<vmem>>, vector<32x1xf32>
    %c0_20 = arith.constant 0 : index
    %c0_21 = arith.constant 0 : index
    %26 = vector.load %arg9[%c0_20, %c0_21] : memref<1x1xf32, #tpu.memory_space<vmem>>, vector<1x1xf32>
    %27 = vector.broadcast %25 : vector<32x1xf32> to vector<32x256xf32>
    %28 = arith.mulf %24, %27 : vector<32x256xf32>
    %cst_22 = arith.constant dense<0.000000e+00> : vector<256xf32>
    %29 = vector.multi_reduction <add>, %28, %cst_22 [0] : vector<32x256xf32> to vector<256xf32>
    %30 = vector.shape_cast %29 : vector<256xf32> to vector<1x256xf32>
    %31 = vector.broadcast %26 : vector<1x1xf32> to vector<1x256xf32>
    %32 = arith.addf %30, %31 : vector<1x256xf32>
    %33 = arith.negf %32 : vector<1x256xf32>
    %34 = math.exp %33 : vector<1x256xf32>
    %cst_23 = arith.constant 1.000000e+00 : f32
    %35 = vector.broadcast %cst_23 : f32 to vector<1x256xf32>
    %36 = arith.addf %35, %34 : vector<1x256xf32>
    %37 = arith.divf %35, %36 : vector<1x256xf32>
    %c0_24 = arith.constant 0 : index
    %c0_25 = arith.constant 0 : index
    %38 = vector.load %arg10[%c0_24, %c0_25] : memref<1x256xf32, #tpu.memory_space<vmem>>, vector<1x256xf32>
    tpu.vector_store %arg10[%c0_24, %c0_25], %37 {strides = array<i32>} : memref<1x256xf32, #tpu.memory_space<vmem>>, vector<1x256xf32>,
    return
  }
  func.func @transform_0(%arg0: i32) -> (i32, i32) {
    %c0_i32 = arith.constant 0 : i32
    %c0_i32_0 = arith.constant 0 : i32
    return %c0_i32, %arg0 : i32, i32
  }
  func.func @transform_1(%arg0: i32) -> (i32, i32) {
    %c0_i32 = arith.constant 0 : i32
    %c0_i32_0 = arith.constant 0 : i32
    %c0_i32_1 = arith.constant 0 : i32
    return %c0_i32, %c0_i32_0 : i32, i32
  }
  func.func @transform_2(%arg0: i32) -> (i32, i32) {
    %c0_i32 = arith.constant 0 : i32
    %c0_i32_0 = arith.constant 0 : i32
    %c0_i32_1 = arith.constant 0 : i32
    return %c0_i32, %c0_i32_0 : i32, i32
  }
  func.func @transform_3(%arg0: i32) -> (i32, i32) {
    %c0_i32 = arith.constant 0 : i32
    %c0_i32_0 = arith.constant 0 : i32
    %c0_i32_1 = arith.constant 0 : i32
    return %c0_i32, %c0_i32_0 : i32, i32
  }
  func.func @transform_4(%arg0: i32) -> (i32, i32) {
    %c0_i32 = arith.constant 0 : i32
    %c0_i32_0 = arith.constant 0 : i32
    %c0_i32_1 = arith.constant 0 : i32
    return %c0_i32, %c0_i32_0 : i32, i32
  }
  func.func @transform_5(%arg0: i32) -> (i32, i32) {
    %c0_i32 = arith.constant 0 : i32
    %c0_i32_0 = arith.constant 0 : i32
    %c0_i32_1 = arith.constant 0 : i32
    return %c0_i32, %c0_i32_0 : i32, i32
  }
  func.func @transform_6(%arg0: i32) -> (i32, i32) {
    %c0_i32 = arith.constant 0 : i32
    %c0_i32_0 = arith.constant 0 : i32
    %c0_i32_1 = arith.constant 0 : i32
    return %c0_i32, %c0_i32_0 : i32, i32
  }
  func.func @transform_7(%arg0: i32) -> (i32, i32) {
    %c0_i32 = arith.constant 0 : i32
    %c0_i32_0 = arith.constant 0 : i32
    %c0_i32_1 = arith.constant 0 : i32
    return %c0_i32, %c0_i32_0 : i32, i32
  }
  func.func @transform_8(%arg0: i32) -> (i32, i32) {
    %c0_i32 = arith.constant 0 : i32
    %c0_i32_0 = arith.constant 0 : i32
    %c0_i32_1 = arith.constant 0 : i32
    return %c0_i32, %c0_i32_0 : i32, i32
  }
  func.func @transform_9(%arg0: i32) -> (i32, i32) {
    %c0_i32 = arith.constant 0 : i32
    %c0_i32_0 = arith.constant 0 : i32
    return %c0_i32, %arg0 : i32, i32
  }
}

</mosaic_0001>

<bundles_post_ra>
// kernel: tpu_custom_call.1
= control target key start
LH: loop header
LB: loop body
LE: loop exit
PB: predicated region body
PF: predicated region fallthrough
CT: control target
= control target key end

     0   :  { %s1987_s0 = inlined_call_operand.hbm [shape: f32[16,512], index: 0, kind: input, shape index: {}]   ;;  %s1988_s1 = inlined_call_operand.hbm [shape: bf16[32,16], index: 1, kind: input, shape index: {}]   ;;  %s1989_s2 = inlined_call_operand.hbm [shape: f32[32,1], index: 2, kind: input, shape index: {}]   ;;  %s1990_s3 = inlined_call_operand.hbm [shape: bf16[32,32], index: 3, kind: input, shape index: {}]   ;;  %s1991_s4 = inlined_call_operand.hbm [shape: f32[32,1], index: 4, kind: input, shape index: {}]   ;;  %s1992_s5 = inlined_call_operand.hbm [shape: bf16[32,32], index: 5, kind: input, shape index: {}]   ;;  %s1993_s6 = inlined_call_operand.hbm [shape: f32[32,1], index: 6, kind: input, shape index: {}]   ;;  %s1994_s7 = inlined_call_operand.hbm [shape: f32[32,1], index: 7, kind: input, shape index: {}]   ;;  %s1995_s8 = inlined_call_operand.<no memory space> [shape: f32[1,1], index: 8, kind: input, shape index: {}]   ;;  %s1996_s9 = inlined_call_operand.hbm [shape: f32[1,512], index: 9, kind: output, shape index: {}]  }
   0x1   :  { %v14_v0 = vstv %s1995_s8 }
   0x2   :  { %15 = vst [vmem:[#allocation2] sm:$0x1] %v14_v0 }
   0x3   :  { %16 = vsyncpa [#allocation4], 0 }
   0x4   :  { %18 = vsyncpa [#allocation4 + $0x1], 0 }
   0x5   :  { %19 = vsyncpa [#allocation7], 0 }
   0x6   :  { %20 = vsyncpa [#allocation10], 0 }
   0x7   :  { %21 = vsyncpa [#allocation13], 0 }
   0x8   :  { %22 = vsyncpa [#allocation16], 0 }
   0x9   :  { %23 = vsyncpa [#allocation5], 0 }
   0xa   :  { %25 = vsyncpa [#allocation5 + $0x1], 0  ;;  %s1607_s11 = smov 0   ;;  %s1609_s12 = smov 0  }
   0xb   :  { %s1611_s13 = smov 0   ;;  %s1613_s14 = smov 0  }
   0xc LB: > { %s1536_s8 = smov [#allocation6]   ;;  %s1628_s16 = sadd.s32 4294967295, %s1534_s14   ;;  %s1534_s14 = sphi %s1613_s14, %s2023_s14   ;;  %s1530_s13 = sphi %s1611_s13, %s2022_s13   ;;  %s1526_s12 = sphi %s1609_s12, %s2021_s12   ;;  %s1522_s11 = sphi %s1607_s11, %s2020_s11  }
   0xd   : > { %s268_s15 = sshll.u32 %s1536_s8, 4  ;;  %p1039_p0 = scmp.ge.s32.totalorder %s1534_s14, 1  ;;  %s1633_s15 = int_to_ptr.vmem [resolvable:$true] %s268_s15 }
   0xe   : > { %p1997_p1 = scmp.eq.s32.totalorder %s1628_s16, 0  ;;  %p256_p2 = scmp.lt.s32.totalorder %s1534_s14, 3 }
   0xf   : > { %s1537_s18 = smov [#allocation9]   ;;  %s1538_s21 = smov [#allocation12]  }
  0x10   : > { %p1635_p3 = pnand %p1039_p0, %p256_p2  ;;  %s294_s19 = sshll.u32 %s1537_s18, 4  ;;  %s1648_s19 = int_to_ptr.vmem [resolvable:$true] %s294_s19 }
  0x11   : > { %s320_s22 = sshll.u32 %s1538_s21, 4  ;;  %s1226_s25 = scalar_lea.hbm %s1988_s1, 256  ;;  %s1650_s22 = int_to_ptr.vmem [resolvable:$true] %s320_s22 }
  0x12   : > { %s2000_s17 = scalar_select %p1635_p3, 1, 0 }
  0x13   : > { %p1116_p5 = pneg %p1635_p3  ;;  %p1227_p7 = scmp.ne.s32.totalorder %s1988_s1, %s1226_s25 }
  0x14   : > { %p1233_p11 = scmp.lt.u32.totalorder %s1226_s25, %s1988_s1 }
  0x15   : > { %p1644_p6 = pnand %p1116_p5, %p1997_p1 }
  0x17   : > { %p1660_p8 = pneg %p1644_p6 }
  0x19   : > { %p1229_p9 = pnand %p1660_p8, %p1227_p7 }
  0x1b   : > { %p1230_p10 = pneg %p1229_p9 }
  0x1d   : > { %p1235_p12 = pnand %p1233_p11, %p1230_p10 }
  0x1f   : > { %1238 = shalt.err (!%p1235_p12)
}
  0x20   : > { %s1239_s10 = scalar_lea.vmem %s1633_s15, 256  ;;  %p1247_p5 = scmp.lt.s32.totalorder %s1633_s15, %s1633_s15 }
  0x21   : > { %p1240_p13 = scmp.ne.s32.totalorder %s1633_s15, %s1239_s10  ;;  %p1248_p4 = scmp.lt.s32.totalorder %s1239_s10, %s1239_s10 }
  0x23   : > { %p1242_p0 = pnand %p1240_p13, %p1660_p8  ;;  %p1249_p7 = por %p1248_p4, %p1247_p5 }
  0x25   : > { %p1243_p2 = pneg %p1242_p0 }
  0x27   : > { %p1250_p9 = pnand %p1249_p7, %p1243_p2 }
  0x29   : > { %1253 = shalt.err (!%p1250_p9)
}
  0x2a   : > { %s1539_s8 = smov 64   ;;  %s1540_s18 = smov 4  }
  0x2b   : > { %1119 = dma.hbm_to_vmem [thread:$0]  (!%p1644_p6), %s1988_s1, 256, %s1633_s15, [#allocation7], %s1539_s8, %s1539_s8, %s1540_s18  }
  0x2c   : > { %s1254_s26 = scalar_lea.hbm %s1990_s3, 256 }
  0x2d   : > { %p1255_p4 = scmp.ne.s32.totalorder %s1990_s3, %s1254_s26  ;;  %p1261_p12 = scmp.lt.u32.totalorder %s1254_s26, %s1990_s3 }
  0x2f   : > { %p1257_p10 = pnand %p1255_p4, %p1660_p8 }
  0x31   : > { %p1258_p11 = pneg %p1257_p10 }
  0x33   : > { %p1263_p13 = pnand %p1261_p12, %p1258_p11 }
  0x35   : > { %1266 = shalt.err (!%p1263_p13)
}
  0x36   : > { %s1267_s15 = scalar_lea.vmem %s1648_s19, 256  ;;  %p1275_p7 = scmp.lt.s32.totalorder %s1648_s19, %s1648_s19 }
  0x37   : > { %p1268_p0 = scmp.ne.s32.totalorder %s1648_s19, %s1267_s15  ;;  %p1276_p9 = scmp.lt.s32.totalorder %s1267_s15, %s1267_s15 }
  0x39   : > { %p1270_p2 = pnand %p1268_p0, %p1660_p8  ;;  %p1277_p4 = por %p1276_p9, %p1275_p7 }
  0x3b   : > { %p1271_p5 = pneg %p1270_p2 }
  0x3d   : > { %p1278_p10 = pnand %p1277_p4, %p1271_p5 }
  0x3f   : > { %1281 = shalt.err (!%p1278_p10)
}
  0x40   : > { %1125 = dma.hbm_to_vmem [thread:$0]  (!%p1644_p6), %s1990_s3, 256, %s1648_s19, [#allocation10], %s1539_s8, %s1539_s8, %s1540_s18  }
  0x41   : > { %s1282_s26 = scalar_lea.hbm %s1992_s5, 256 }
  0x42   : > { %p1283_p11 = scmp.ne.s32.totalorder %s1992_s5, %s1282_s26  ;;  %p1289_p0 = scmp.lt.u32.totalorder %s1282_s26, %s1992_s5 }
  0x44   : > { %p1285_p12 = pnand %p1283_p11, %p1660_p8 }
  0x46   : > { %p1286_p13 = pneg %p1285_p12 }
  0x48   : > { %p1291_p2 = pnand %p1289_p0, %p1286_p13 }
  0x4a   : > { %1294 = shalt.err (!%p1291_p2)
}
  0x4b   : > { %s1295_s19 = scalar_lea.vmem %s1650_s22, 256  ;;  %p1303_p4 = scmp.lt.s32.totalorder %s1650_s22, %s1650_s22 }
  0x4c   : > { %p1296_p5 = scmp.ne.s32.totalorder %s1650_s22, %s1295_s19  ;;  %p1304_p10 = scmp.lt.s32.totalorder %s1295_s19, %s1295_s19 }
  0x4e   : > { %p1298_p7 = pnand %p1296_p5, %p1660_p8  ;;  %p1305_p11 = por %p1304_p10, %p1303_p4 }
  0x50   : > { %p1299_p9 = pneg %p1298_p7 }
  0x52   : > { %p1306_p12 = pnand %p1305_p11, %p1299_p9 }
  0x54   : > { %1309 = shalt.err (!%p1306_p12)
}
  0x55   : > { %1131 = dma.hbm_to_vmem [thread:$0]  (!%p1644_p6), %s1992_s5, 256, %s1650_s22, [#allocation13], %s1539_s8, %s1539_s8, %s1540_s18  }
  0x56   : > { %s1541_s23 = smov [#allocation8]   ;;  %s1310_s27 = scalar_lea.hbm %s1989_s2, 512 }
  0x57   : > { %s281_s24 = sshll.u32 %s1541_s23, 4  ;;  %p1311_p13 = scmp.ne.s32.totalorder %s1989_s2, %s1310_s27  ;;  %s282_s24 = int_to_ptr.vmem [resolvable:$true] %s281_s24 }
  0x58   : > { %p1317_p5 = scmp.lt.u32.totalorder %s1310_s27, %s1989_s2 }
  0x59   : > { %p1313_p0 = pnand %p1311_p13, %p1660_p8 }
  0x5b   : > { %p1314_p2 = pneg %p1313_p0 }
  0x5d   : > { %p1319_p7 = pnand %p1317_p5, %p1314_p2 }
  0x5f   : > { %1322 = shalt.err (!%p1319_p7)
}
  0x60   : > { %s1323_s22 = scalar_lea.vmem %s282_s24, 512  ;;  %p1331_p11 = scmp.lt.s32.totalorder %s282_s24, %s282_s24 }
  0x61   : > { %p1324_p9 = scmp.ne.s32.totalorder %s282_s24, %s1323_s22  ;;  %p1332_p12 = scmp.lt.s32.totalorder %s1323_s22, %s1323_s22 }
  0x63   : > { %p1326_p4 = pnand %p1324_p9, %p1660_p8  ;;  %p1333_p1 = por %p1332_p12, %p1331_p11 }
  0x65   : > { %p1327_p10 = pneg %p1326_p4 }
  0x67   : > { %p1334_p3 = pnand %p1333_p1, %p1327_p10 }
  0x69   : > { %1337 = shalt.err (!%p1334_p3)
}
  0x6a   : > { %s1542_s8 = smov 128   ;;  %s1543_s18 = smov 8  }
  0x6b   : > { %1122 = dma.hbm_to_vmem [thread:$0]  (!%p1644_p6), %s1989_s2, 512, %s282_s24, [#allocation7], %s1542_s8, %s1542_s8, %s1543_s18  }
  0x6c   : > { %s1544_s23 = smov [#allocation11]   ;;  %s1545_s26 = smov [#allocation14]  }
  0x6d   : > { %s307_s25 = sshll.u32 %s1544_s23, 4  ;;  %s333_s27 = sshll.u32 %s1545_s26, 4  ;;  %s308_s25 = int_to_ptr.vmem [resolvable:$true] %s307_s25  ;;  %s1757_s27 = int_to_ptr.vmem [resolvable:$true] %s333_s27 }
  0x6e   : > { %s1338_s10 = scalar_lea.hbm %s1991_s4, 512 }
  0x6f   : > { %p1339_p1 = scmp.ne.s32.totalorder %s1991_s4, %s1338_s10  ;;  %p1345_p0 = scmp.lt.u32.totalorder %s1338_s10, %s1991_s4 }
  0x71   : > { %p1341_p3 = pnand %p1339_p1, %p1660_p8 }
  0x73   : > { %p1342_p13 = pneg %p1341_p3 }
  0x75   : > { %p1347_p2 = pnand %p1345_p0, %p1342_p13 }
  0x77   : > { %1350 = shalt.err (!%p1347_p2)
}
  0x78   : > { %s1351_s21 = scalar_lea.vmem %s308_s25, 512  ;;  %p1359_p4 = scmp.lt.s32.totalorder %s308_s25, %s308_s25 }
  0x79   : > { %p1352_p5 = scmp.ne.s32.totalorder %s308_s25, %s1351_s21  ;;  %p1360_p10 = scmp.lt.s32.totalorder %s1351_s21, %s1351_s21 }
  0x7b   : > { %p1354_p7 = pnand %p1352_p5, %p1660_p8  ;;  %p1361_p11 = por %p1360_p10, %p1359_p4 }
  0x7d   : > { %p1355_p9 = pneg %p1354_p7 }
  0x7f   : > { %p1362_p12 = pnand %p1361_p11, %p1355_p9 }
  0x81   : > { %1365 = shalt.err (!%p1362_p12)
}
  0x82   : > { %1128 = dma.hbm_to_vmem [thread:$0]  (!%p1644_p6), %s1991_s4, 512, %s308_s25, [#allocation10], %s1542_s8, %s1542_s8, %s1543_s18  }
  0x83   : > { %s1366_s10 = scalar_lea.hbm %s1993_s6, 512 }
  0x84   : > { %p1367_p1 = scmp.ne.s32.totalorder %s1993_s6, %s1366_s10  ;;  %p1373_p0 = scmp.lt.u32.totalorder %s1366_s10, %s1993_s6 }
  0x86   : > { %p1369_p3 = pnand %p1367_p1, %p1660_p8 }
  0x88   : > { %p1370_p13 = pneg %p1369_p3 }
  0x8a   : > { %p1375_p2 = pnand %p1373_p0, %p1370_p13 }
  0x8c   : > { %1378 = shalt.err (!%p1375_p2)
}
  0x8d   : > { %s1379_s25 = scalar_lea.vmem %s1757_s27, 512  ;;  %p1387_p4 = scmp.lt.s32.totalorder %s1757_s27, %s1757_s27 }
  0x8e   : > { %p1380_p5 = scmp.ne.s32.totalorder %s1757_s27, %s1379_s25  ;;  %p1388_p10 = scmp.lt.s32.totalorder %s1379_s25, %s1379_s25 }
  0x90   : > { %p1382_p7 = pnand %p1380_p5, %p1660_p8  ;;  %p1389_p11 = por %p1388_p10, %p1387_p4 }
  0x92   : > { %p1383_p9 = pneg %p1382_p7 }
  0x94   : > { %p1390_p12 = pnand %p1389_p11, %p1383_p9 }
  0x96   : > { %1393 = shalt.err (!%p1390_p12)
}
  0x97   : > { %1134 = dma.hbm_to_vmem [thread:$0]  (!%p1644_p6), %s1993_s6, 512, %s1757_s27, [#allocation13], %s1542_s8, %s1542_s8, %s1543_s18  }
  0x98   : > { %s1546_s26 = smov [#allocation15]   ;;  %s1394_s19 = scalar_lea.hbm %s1994_s7, 512 }
  0x99   : > { %s346_s29 = sshll.u32 %s1546_s26, 4  ;;  %p1395_p1 = scmp.ne.s32.totalorder %s1994_s7, %s1394_s19  ;;  %s347_s29 = int_to_ptr.vmem [resolvable:$true] %s346_s29 }
  0x9a   : > { %p1401_p0 = scmp.lt.u32.totalorder %s1394_s19, %s1994_s7 }
  0x9b   : > { %p1397_p3 = pnand %p1395_p1, %p1660_p8 }
  0x9d   : > { %p1398_p13 = pneg %p1397_p3 }
  0x9f   : > { %p1403_p2 = pnand %p1401_p0, %p1398_p13 }
  0xa1   : > { %1406 = shalt.err (!%p1403_p2)
}
  0xa2   : > { %s1407_s27 = scalar_lea.vmem %s347_s29, 512  ;;  %p1415_p4 = scmp.lt.s32.totalorder %s347_s29, %s347_s29 }
  0xa3   : > { %p1408_p5 = scmp.ne.s32.totalorder %s347_s29, %s1407_s27  ;;  %p1416_p10 = scmp.lt.s32.totalorder %s1407_s27, %s1407_s27 }
  0xa5   : > { %p1410_p7 = pnand %p1408_p5, %p1660_p8  ;;  %p1417_p11 = por %p1416_p10, %p1415_p4 }
  0xa7   : > { %p1411_p9 = pneg %p1410_p7 }
  0xa9   : > { %p1418_p12 = pnand %p1417_p11, %p1411_p9 }
  0xab   : > { %1421 = shalt.err (!%p1418_p12)
}
  0xac   : > { %1137 = dma.hbm_to_vmem [thread:$0]  (!%p1644_p6), %s1994_s7, 512, %s347_s29, [#allocation16], %s1542_s8, %s1542_s8, %s1543_s18  }
  0xad   : > { %s1038_s20 = sadd.s32 4294967294, %s1534_s14   ;;  %s1829_s28 = sadd.s32 1, %s1534_s14  }
  0xae   : > { %s38_s26 = sadd.s32 1, %s1530_s13  ;;  %s35_s30 = ssub.s32 %s1534_s14, %s1829_s28 }
  0xaf   : > { %p45_p8 = scmp.ne.s32.totalorder %s1530_s13, %s1526_s12  ;;  %p36_p1 = scmp.eq.s32.totalorder %s35_s30, 0 }
  0xb0   : > { %p46_p3 = scmp.eq.s32.totalorder %s1534_s14, 0  ;;  %p51_p13 = scmp.ne.s32.totalorder %s1526_s12, %s1522_s11 }
  0xb1   : > { %p243_p0 = scmp.eq.s32.totalorder %s1628_s16, 1  ;;  %p2003_p5 = scmp.eq.s32.totalorder %s1628_s16, 0 }
  0xb2   : > { %s1841_s10 = scalar_select %p36_p1, %s1530_s13, %s38_s26  }
  0xb3   : > { %p47_p2 = por %p46_p3, %p45_p8  ;;  %p1845_p7 = por %p2003_p5, %p51_p13 }
  0xb4   : > { %p1849_p6 = por %p243_p0, %p45_p8  ;;  %p249_p9 = scmp.eq.s32.totalorder %s1038_s20, 1 }
  0xb5   : > { %p1153_p4 = scmp.lt.s32.totalorder %s1534_s14, 2  ;;  %s363_s18 = sand.u32 1, %s1530_s13  }
  0xb6   : > { %s2005_s8 = scalar_select %p1849_p6, 1, 0 }
  0xb7   : > { %p1855_p10 = por %p249_p9, %p51_p13  ;;  %s1048_s22 = sshll.u32 %s363_s18, 5 }
  0xb8   : > { %s1080_s15 = sshll.u32 %s1534_s14, 8  ;;  %s367_s21 = scalar_lea.vmem [#allocation3], %s1048_s22 }
  0xb9   : > { %s2006_s29 = scalar_select %p1855_p10, 1, 0 }
  0xba   : > { %s1863_s27 = scalar_lea.hbm %s1987_s0, %s1080_s15  ;;  %s374_s23 = sshll.u32 %s367_s21, 4  ;;  %s1869_s23 = int_to_ptr.vmem [resolvable:$true] %s374_s23 }
  0xbb   : > { %p1865_p11 = pnand %p1153_p4, %p47_p2  ;;  %s1871_s26 = scalar_lea.sflag [#allocation4], %s363_s18 }
  0xbc   : > { %s1422_s30 = scalar_lea.hbm %s1863_s27, 512  ;;  %s1427_s24 = scalar_lea.hbm %s1987_s0, 1024 }
  0xbd   : > { %p1423_p12 = scmp.ne.s32.totalorder %s1863_s27, %s1422_s30  ;;  %p1424_p8 = pneg %p1865_p11 }
  0xbe   : > { %p1428_p13 = scmp.lt.u32.totalorder %s1863_s27, %s1987_s0  ;;  %p1429_p0 = scmp.lt.u32.totalorder %s1427_s24, %s1422_s30 }
  0xbf   : > { %p1425_p1 = pnand %p1424_p8, %p1423_p12  ;;  %p1431_p5 = scmp.lt.u32.totalorder %s1422_s30, %s1863_s27 }
  0xc0   : > { %p1430_p2 = por %p1429_p0, %p1428_p13 }
  0xc1   : > { %p1426_p3 = pneg %p1425_p1 }
  0xc2   : > { %p1432_p9 = por %p1431_p5, %p1430_p2 }
  0xc4   : > { %p1433_p4 = pnand %p1432_p9, %p1426_p3 }
  0xc6   : > { %1436 = shalt.err (!%p1433_p4)
}
  0xc7   : > { %s1437_s18 = scalar_lea.vmem %s1869_s23, 512  ;;  %s1547_s22 = smov [#allocation3]  }
  0xc8   : > { %p1438_p12 = scmp.ne.s32.totalorder %s1869_s23, %s1437_s18  ;;  %s1442_s15 = sshll.u32 %s1547_s22, 4  ;;  %s1443_s15 = int_to_ptr.vmem [resolvable:$false] %s1442_s15 }
  0xc9   : > { %s1444_s25 = scalar_lea.vmem %s1443_s15, 1024  ;;  %p1445_p6 = scmp.lt.s32.totalorder %s1869_s23, %s1443_s15 }
  0xca   : > { %p1440_p1 = pnand %p1438_p12, %p1424_p8  ;;  %p1446_p13 = scmp.lt.s32.totalorder %s1444_s25, %s1437_s18 }
  0xcc   : > { %p1441_p10 = pneg %p1440_p1  ;;  %p1447_p0 = por %p1446_p13, %p1445_p6 }
  0xce   : > { %p1448_p2 = pnand %p1447_p0, %p1441_p10 }
  0xd0   : > { %1451 = shalt.err (!%p1448_p2)
}
  0xd1   : > { %s1548_s30 = smov 512   ;;  %s1549_s24 = smov 256  }
  0xd2   : > { %s1550_s21 = smov 16   ;;  %p2008_p8 = scmp.ne.s32.totalorder %s2000_s17, 0 }
  0xd3   : > { %1141 = dma.hbm_to_vmem [thread:$0]  (!%p1865_p11), %s1863_s27, 512, %s1869_s23, %s1871_s26, %s1548_s30, %s1549_s24, %s1550_s21  }
  0xd4   : > { %386 = sbr.rel (%p2008_p8) target bundleno = 993 (0x3e1), region = 56  ;;  %s1902_s22 = sand.u32 (!%p2008_p8), 1, %s1526_s12  }
  0xd5   : > { %s1052_s18 = sshll.u32 (!%p2008_p8), %s1902_s22, 5  ;;  %s389_s15 = scalar_lea.sflag (!%p2008_p8), [#allocation4], %s1902_s22 }
  0xd6   : > { %s392_s25 = scalar_lea.vmem (!%p2008_p8), [#allocation3], %s1052_s18 }
  0xdb   : > { %1497 = dma.done.wait (%p1845_p7), %s389_s15, 512  }
  0xdc   : > { %1499 = vsyncadd (%p1845_p7), %s389_s15, 4294966784  ;;  %p2009_p6 = scmp.eq.s32.totalorder %s1628_s16, 0 }
  0xde   : > { %1501 = dma.done.wait (%p2009_p6), [#allocation7], 768   ;;  %p2010_p10 = pmov %p2009_p6 }
  0xdf   : > { %p2011_p11 = pmov %p2009_p6 }
  0xe0   : > { %1503 = vsyncadd (%p2010_p10), [#allocation7], 4294966528 }
  0xe1   : > { %1505 = dma.done.wait (%p2011_p11), [#allocation10], 768   ;;  %p2012_p3 = pmov %p2009_p6 }
  0xe3   : > { %1507 = vsyncadd (%p2012_p3), [#allocation10], 4294966528  ;;  %p2013_p5 = pmov %p2012_p3 }
  0xe4   : > { %p2014_p9 = pmov %p2012_p3 }
  0xe5   : > { %1509 = dma.done.wait (%p2013_p5), [#allocation13], 768  }
  0xe6   : > { %1511 = vsyncadd (%p2014_p9), [#allocation13], 4294966528  ;;  %p2015_p7 = pmov %p2012_p3 }
  0xe7   : > { %p2016_p4 = pmov %p2012_p3 }
  0xe8   : > { %1513 = dma.done.wait (%p2015_p7), [#allocation16], 512  }
  0xe9   : > { %1515 = vsyncadd (%p2016_p4), [#allocation16], 4294966784  ;;  %v1551_v1 = vmov 0   ;;  %v459_v2 = vld [vmem:[%s392_s25 + $0x8] sm:$0xff]  ;;  %v461_v3 = vld [vmem:[%s392_s25 + $0x18] sm:$0xff]  ;;  %vm502_vm0 = vcmask 130048  }
  0xea   : > { %541 = vmatprep.mubr.bf16.mxu0 %v1551_v1  ;;  %551 = vmatprep.mubr.bf16.mxu1 %v1551_v1  ;;  %v458_v4 = vld [vmem:[%s392_s25] sm:$0xff]  ;;  %v471_v5 = vpack.c.bf16 %v461_v3, %v459_v2  ;;  %v460_v6 = vld [vmem:[%s392_s25 + $0x10] sm:$0xff]  ;;  %v1213_v9 = vld [vmem:[#allocation6 + $0x8] sm:$0xff]   ;;  %vm612_vm1 = vcmask 261120   ;;  %s1060_s17 = sshll.u32 %s1902_s22, 1  ;;  %s1081_s19 = sshll.u32 %s1628_s16, 5 }
  0xeb   : > { %1210 = vset.pattern.permute.xlu0 %v1551_v1  ;;  %1211 = vset.pattern.permute.xlu1 %v1551_v1  ;;  %v470_v7 = vpack.c.bf16 %v460_v6, %v458_v4  ;;  %v1212_v8 = vld [vmem:[#allocation6] sm:$0xff]   ;;  %v466_v10 = vld [vmem:[#allocation8] sm:$0xff]  ;;  %v467_v12 = vld [vmem:[#allocation8 + $0x8] sm:$0xff]  ;;  %s454_s27 = scalar_lea.vmem [#allocation17], %s1060_s17  ;;  %s1943_s30 = scalar_lea.hbm %s1996_s9, %s1081_s19 }
  0xec   : > { %509 = vmatprep.subr.bf16.mxu0 %v471_v5  ;;  %1082 = vmatprep.subr.bf16.mxu1 %v471_v5  ;;  %v468_v11 = vld [vmem:[#allocation8 + $0x10] sm:$0xff]  ;;  %v469_v13 = vld [vmem:[#allocation8 + $0x18] sm:$0xff]  ;;  %v576_v16 = vld [vmem:[#allocation11 + $0x10] sm:$0xff]  ;;  %s901_s23 = sshll.u32 %s454_s27, 4  ;;  %s887_s24 = scalar_lea.sflag [#allocation5], %s1902_s22  ;;  %s1945_s23 = int_to_ptr.vmem [resolvable:$true] %s901_s23 }
  0xed   : > { %510 = vmatpush1.bf16.msra.mxu0 %v470_v7  ;;  %1083 = vmatpush1.bf16.msra.mxu1 %v470_v7  ;;  %v574_v14 = vld [vmem:[#allocation11] sm:$0xff]  ;;  %v575_v15 = vld [vmem:[#allocation11 + $0x8] sm:$0xff]  ;;  %v577_v17 = vld [vmem:[#allocation11 + $0x18] sm:$0xff]  ;;  %s1452_s21 = scalar_lea.vmem %s1945_s23, 32  ;;  %p2017_p1 = scmp.ne.s32.totalorder %s2005_s8, 0 }
  0xee   : > { %474 = vperm.xlu0 %1210, %v466_v10   ;;  %484 = vperm.xlu1 %1211, %v468_v11   ;;  %v684_v18 = vld [vmem:[#allocation14] sm:$0xff]  ;;  %v685_v19 = vld [vmem:[#allocation14 + $0x8] sm:$0xff]  ;;  %v686_v20 = vld [vmem:[#allocation14 + $0x10] sm:$0xff]  ;;  %p1453_p12 = scmp.ne.s32.totalorder %s1945_s23, %s1452_s21  ;;  %s1553_s16 = smov [#allocation17]  }
  0xef   : > { %v687_v21 = vld [vmem:[#allocation14 + $0x18] sm:$0xff]  ;;  %v789_v22 = vld [vmem:[#allocation15] sm:$0xff]  ;;  %v790_v23 = vld [vmem:[#allocation15 + $0x8] sm:$0xff]  ;;  %s1456_s18 = sshll.u32 %s1553_s16, 4  ;;  %s1457_s18 = int_to_ptr.vmem [resolvable:$false] %s1456_s18 }
  0xf0   : > { %1063 = vmatmul.mubr.msk.bf16.vlgmr.msra.gmra.mrb[0].mxu0 %vm502_vm0, %v1212_v8  ;;  %1064 = vmatmul.mubr.msk.bf16.vlgmr.msra.gmra.mrb[0].mxu1 %vm502_vm0, %v1213_v9  ;;  %v791_v24 = vld [vmem:[#allocation15 + $0x10] sm:$0xff]  ;;  %v792_v25 = vld [vmem:[#allocation15 + $0x18] sm:$0xff]  ;;  %v793_v26 = vld [vmem:[#allocation2] sm:$0x1]  ;;  %p1454_p13 = pnand %p1453_p12, %p2017_p1  ;;  %s1458_s15 = scalar_lea.vmem %s1457_s18, 64 }
  0xf1   : > { %651 = vmatprep.mubr.bf16.mxu1 %v1551_v1  ;;  %760 = vmatprep.mubr.bf16.mxu0 %v1551_v1  ;;  %v1214_v59 = vld [vmem:[#allocation9] sm:$0xff]   ;;  %v1215_v60 = vld [vmem:[#allocation9 + $0x8] sm:$0xff]   ;;  %p1459_p2 = scmp.lt.s32.totalorder %s1945_s23, %s1457_s18  ;;  %p1460_p8 = scmp.lt.s32.totalorder %s1458_s15, %s1452_s21 }
  0xf2   : > { %479 = vperm.xlu0 %1210, %v467_v12   ;;  %489 = vperm.xlu1 %1211, %v469_v13   ;;  %p1455_p0 = pneg %p1454_p13 }
  0xf3   : > { %p1461_p6 = por %p1460_p8, %p1459_p2 }
  0xf5   : > { %p1462_p10 = pnand %p1461_p6, %p1455_p0 }
  0xf6   : > { %584 = vperm.xlu0 %1210, %v574_v14   ;;  %589 = vperm.xlu1 %1211, %v575_v15  }
  0xfa   : > { %594 = vperm.xlu0 %1210, %v576_v16   ;;  %599 = vperm.xlu1 %1211, %v577_v17  }
  0xfe   : > { %694 = vperm.xlu0 %1210, %v684_v18   ;;  %699 = vperm.xlu1 %1211, %v685_v19  }
 0x102   : > { %704 = vperm.xlu0 %1210, %v686_v20   ;;  %709 = vperm.xlu1 %1211, %v687_v21  }
 0x106   : > { %796 = vperm.xlu0 %1210, %v789_v22   ;;  %801 = vperm.xlu1 %1211, %v790_v23  }
 0x10a   : > { %806 = vperm.xlu0 %1210, %v791_v24   ;;  %811 = vperm.xlu1 %1211, %v792_v25  }
 0x10e   : > { %842 = vperm.xlu0 %1210, %v793_v26  }
 0x16d   : > { %v475_v27 = vpop.permute.xlu0 %474  ;;  %v485_v28 = vpop.permute.xlu1 %484 }
 0x171   : > { %v480_v29 = vpop.permute.xlu0 %479  ;;  %v490_v30 = vpop.permute.xlu1 %489 }
 0x175   : > { %v585_v61 = vpop.permute.xlu0 %584  ;;  %v590_v2 = vpop.permute.xlu1 %589 }
 0x179   : > { %v595_v13 = vpop.permute.xlu0 %594  ;;  %v600_v18 = vpop.permute.xlu1 %599 }
 0x1c3   : > { %v543_v31 = vpop.f32.mrb[0].mxu0  ;;  %v553_v32 = vpop.f32.mrb[0].mxu1 }
 0x1c4   : > { %v544_v33 = vadd.f32 %v543_v31, %v475_v27  ;;  %v554_v34 = vadd.f32 %v553_v32, %v485_v28  ;;  %v545_v35 = vpop.f32.mrb[1].mxu0  ;;  %v555_v36 = vpop.f32.mrb[1].mxu1  ;;  %v1217_v31 = vld [vmem:[#allocation12 + $0x8] sm:$0xff]  }
 0x1c5   : > { %v546_v37 = vadd.f32 %v545_v35, %v475_v27  ;;  %v556_v38 = vadd.f32 %v555_v36, %v485_v28  ;;  %v547_v39 = vpop.f32.mrb[2].mxu0  ;;  %v557_v40 = vpop.f32.mrb[2].mxu1 }
 0x1c6   : > { %v566_v41 = vmax.f32 %v554_v34, 0.0  ;;  %v548_v42 = vadd.f32 %v547_v39, %v480_v29  ;;  %v558_v43 = vadd.f32 %v557_v40, %v490_v30  ;;  %v549_v44 = vpop.f32.mrb[3].mxu0  ;;  %v559_v45 = vpop.f32.mrb[3].mxu1  ;;  %v562_v49 = vmax.f32 %v544_v33, 0.0 }
 0x1c7   : > { %v567_v46 = vmax.f32 %v556_v38, 0.0  ;;  %v550_v47 = vadd.f32 %v549_v44, %v480_v29  ;;  %v560_v48 = vadd.f32 %v559_v45, %v490_v30  ;;  %v563_v52 = vmax.f32 %v546_v37, 0.0  ;;  %v1216_v30 = vld [vmem:[#allocation12] sm:$0xff]   ;;  %v695_v32 = vpop.permute.xlu0 %694  ;;  %v700_v33 = vpop.permute.xlu1 %699 }
 0x1c8   : > { %v564_v50 = vmax.f32 %v548_v42, 0.0  ;;  %v568_v51 = vmax.f32 %v558_v43, 0.0 }
 0x1c9   : > { %v565_v53 = vmax.f32 %v550_v47, 0.0  ;;  %v569_v54 = vmax.f32 %v560_v48, 0.0 }
 0x1ca   : > { %v578_v55 = vpack.c.bf16 %v564_v50, %v562_v49  ;;  %v580_v56 = vpack.c.bf16 %v568_v51, %v566_v41 }
 0x1cb   : > { %v579_v57 = vpack.c.bf16 %v565_v53, %v563_v52  ;;  %v581_v58 = vpack.c.bf16 %v569_v54, %v567_v46  ;;  %v705_v34 = vpop.permute.xlu0 %704  ;;  %v710_v35 = vpop.permute.xlu1 %709 }
 0x1cd   : > { %619 = vmatprep.subr.bf16.mxu1 %v579_v57 }
 0x1ce   : > { %620 = vmatpush1.bf16.msra.mxu1 %v578_v55 }
 0x1cf   : > { %621 = vmatprep.subr.bf16.mxu1 %v581_v58  ;;  %v797_v47 = vpop.permute.xlu0 %796 }
 0x1d2   : > { %622 = vmatpush1.bf16.msra.mxu1 %v580_v56 }
 0x1d5   : > { %1067 = vmatmul.mubr.msk.bf16.vlgmr.msra.gmra.mrb[4].mxu1 %vm612_vm1, %v1214_v59 }
 0x1d6   : > { %661 = vmatprep.mubr.bf16.mxu1 %v1551_v1 }
 0x1dd   : > { %1068 = vmatmul.mubr.msk.bf16.gmra.mrb[8].mxu1 %vm612_vm1, %v1215_v60 }
 0x2a8   : > { %v653_v62 = vpop.f32.mrb[4].mxu1 }
 0x2a9   : > { %v654_v63 = vadd.f32 %v653_v62, %v585_v61  ;;  %v655_v0 = vpop.f32.mrb[5].mxu1 }
 0x2aa   : > { %v656_v3 = vadd.f32 %v655_v0, %v585_v61  ;;  %v657_v4 = vpop.f32.mrb[6].mxu1 }
 0x2ab   : > { %v658_v5 = vadd.f32 %v657_v4, %v590_v2  ;;  %v659_v6 = vpop.f32.mrb[7].mxu1  ;;  %v672_v8 = vmax.f32 %v654_v63, 0.0  ;;  %v807_v63 = vpop.permute.xlu0 %806 }
 0x2ac   : > { %v660_v7 = vadd.f32 %v659_v6, %v590_v2  ;;  %v673_v10 = vmax.f32 %v656_v3, 0.0 }
 0x2ad   : > { %v674_v9 = vmax.f32 %v658_v5, 0.0 }
 0x2ae   : > { %v675_v11 = vmax.f32 %v660_v7, 0.0 }
 0x2af   : > { %v688_v12 = vpack.c.bf16 %v674_v9, %v672_v8 }
 0x2b0   : > { %v689_v14 = vpack.c.bf16 %v675_v11, %v673_v10  ;;  %v663_v15 = vpop.f32.mrb[8].mxu1 }
 0x2b1   : > { %v664_v16 = vadd.f32 %v663_v15, %v595_v13  ;;  %v665_v17 = vpop.f32.mrb[9].mxu1 }
 0x2b2   : > { %v666_v19 = vadd.f32 %v665_v17, %v595_v13  ;;  %v667_v20 = vpop.f32.mrb[10].mxu1  ;;  %728 = vmatprep.subr.bf16.mxu0 %v689_v14 }
 0x2b3   : > { %v668_v21 = vadd.f32 %v667_v20, %v600_v18  ;;  %v669_v22 = vpop.f32.mrb[11].mxu1  ;;  %729 = vmatpush1.bf16.msra.mxu0 %v688_v12  ;;  %v676_v24 = vmax.f32 %v664_v16, 0.0  ;;  %v845_v12 = vlaneseq }
 0x2b4   : > { %v670_v23 = vadd.f32 %v669_v22, %v600_v18  ;;  %v677_v26 = vmax.f32 %v666_v19, 0.0 }
 0x2b5   : > { %v678_v25 = vmax.f32 %v668_v21, 0.0  ;;  %v846_v17 = vshrl.u32 %v845_v12, 7  ;;  %vm883_vm2 = vcmp.lt.s32.totalorder %v845_v12, 256 }
 0x2b6   : > { %v679_v27 = vmax.f32 %v670_v23, 0.0 }
 0x2b7   : > { %v690_v28 = vpack.c.bf16 %v678_v25, %v676_v24  ;;  %v847_v22 = vsub.s32 0, %v846_v17  ;;  %v843_v24 = vpop.permute.xlu0 %842 }
 0x2b8   : > { %v691_v29 = vpack.c.bf16 %v679_v27, %v677_v26 }
 0x2ba   : > { %730 = vmatprep.subr.bf16.mxu0 %v691_v29 }
 0x2bb   : > { %731 = vmatpush1.bf16.msra.mxu0 %v690_v28  ;;  %v848_v28 = vrot.slane %v843_v24, %v847_v22 }
 0x2be   : > { %1071 = vmatmul.mubr.msk.bf16.vlgmr.msra.gmra.mrb[4].mxu0 %vm612_vm1, %v1216_v30 }
 0x2bf   : > { %770 = vmatprep.mubr.bf16.mxu0 %v1551_v1  ;;  %v802_v1 = vpop.permute.xlu1 %801 }
 0x2c3   : > { %v812_v5 = vpop.permute.xlu1 %811 }
 0x2c6   : > { %1072 = vmatmul.mubr.msk.bf16.gmra.mrb[8].mxu0 %vm612_vm1, %v1217_v31 }
 0x391   : > { %v762_v36 = vpop.f32.mrb[4].mxu0 }
 0x392   : > { %v763_v37 = vadd.f32 %v762_v36, %v695_v32  ;;  %v764_v38 = vpop.f32.mrb[5].mxu0 }
 0x393   : > { %v765_v39 = vadd.f32 %v764_v38, %v695_v32  ;;  %v766_v40 = vpop.f32.mrb[6].mxu0 }
 0x394   : > { %v781_v41 = vmax.f32 %v763_v37, 0.0  ;;  %v767_v42 = vadd.f32 %v766_v40, %v700_v33  ;;  %v768_v43 = vpop.f32.mrb[7].mxu0 }
 0x395   : > { %v782_v44 = vmax.f32 %v765_v39, 0.0  ;;  %v769_v45 = vadd.f32 %v768_v43, %v700_v33  ;;  %v1552_v39 = vmov 1966171168  }
 0x396   : > { %v783_v46 = vmax.f32 %v767_v42, 0.0  ;;  %v814_v49 = vmul.f32 %v797_v47, %v781_v41  ;;  %v867_v40 = vunpack.c.l.s4 %v1552_v39 }
 0x397   : > { %v784_v48 = vmax.f32 %v769_v45, 0.0  ;;  %v815_v51 = vmul.f32 %v797_v47, %v782_v44 }
 0x398   : > { %v816_v50 = vmul.f32 %v802_v1, %v783_v46  ;;  %v868_v41 = vunpack.c.0.s8 %v867_v40 }
 0x399   : > { %v817_v52 = vmul.f32 %v802_v1, %v784_v48  ;;  %v772_v53 = vpop.f32.mrb[8].mxu0 }
 0x39a   : > { %v822_v54 = vadd.f32 %v816_v50, %v814_v49  ;;  %v773_v55 = vadd.f32 %v772_v53, %v705_v34  ;;  %v774_v56 = vpop.f32.mrb[9].mxu0  ;;  %v871_v43 = vsub.s32 %v868_v41, %v846_v17 }
 0x39b   : > { %v831_v57 = vadd.f32 %v817_v52, %v815_v51  ;;  %v775_v58 = vadd.f32 %v774_v56, %v705_v34  ;;  %v776_v59 = vpop.f32.mrb[10].mxu0 }
 0x39c   : > { %v785_v60 = vmax.f32 %v773_v55, 0.0  ;;  %v777_v61 = vadd.f32 %v776_v59, %v710_v35  ;;  %v778_v62 = vpop.f32.mrb[11].mxu0 }
 0x39d   : > { %v786_v0 = vmax.f32 %v775_v58, 0.0  ;;  %v779_v2 = vadd.f32 %v778_v62, %v710_v35 }
 0x39e   : > { %v818_v3 = vmul.f32 %v807_v63, %v785_v60  ;;  %v787_v4 = vmax.f32 %v777_v61, 0.0 }
 0x39f   : > { %v819_v6 = vmul.f32 %v807_v63, %v786_v0  ;;  %v788_v7 = vmax.f32 %v779_v2, 0.0 }
 0x3a0   : > { %v823_v8 = vadd.f32 %v822_v54, %v818_v3  ;;  %v820_v9 = vmul.f32 %v812_v5, %v787_v4 }
 0x3a1   : > { %v832_v10 = vadd.f32 %v831_v57, %v819_v6  ;;  %v821_v11 = vmul.f32 %v812_v5, %v788_v7 }
 0x3a2   : > { %v824_v13 = vadd.f32 %v823_v8, %v820_v9 }
 0x3a3   : > { %v833_v14 = vadd.f32 %v832_v10, %v821_v11 }
 0x3a4   : > { %v825_v15 = vrot.slane %v824_v13, 4 }
 0x3a5   : > { %v834_v16 = vrot.slane %v833_v14, 4 }
 0x3a6   : > { %v826_v18 = vadd.f32 %v825_v15, %v824_v13 }
 0x3a7   : > { %v835_v19 = vadd.f32 %v834_v16, %v833_v14 }
 0x3a8   : > { %v827_v20 = vrot.slane %v826_v18, 2 }
 0x3a9   : > { %v836_v21 = vrot.slane %v835_v19, 2 }
 0x3aa   : > { %v828_v23 = vadd.f32 %v827_v20, %v826_v18 }
 0x3ab   : > { %v837_v25 = vadd.f32 %v836_v21, %v835_v19 }
 0x3ac   : > { %v829_v26 = vrot.slane %v828_v23, 1 }
 0x3ad   : > { %v838_v27 = vrot.slane %v837_v25, 1 }
 0x3ae   : > { %v830_v29 = vadd.f32 %v829_v26, %v828_v23 }
 0x3af   : > { %v839_v30 = vadd.f32 %v838_v27, %v837_v25 }
 0x3b0   : > { %v849_v31 = vadd.f32 %v848_v28, %v830_v29 }
 0x3b1   : > { %v850_v32 = vadd.f32 %v848_v28, %v839_v30 }
 0x3b2   : > { %v1073_v33 = vmul.f32 -1.442695, %v849_v31 }
 0x3b3   : > { %v1074_v34 = vmul.f32 -1.442695, %v850_v32 }
 0x3b4   : > { %1218 = vpow2.f32 %v1073_v33 }
 0x3b5   : > { %1220 = vpow2.f32 %v1074_v34 }
 0x3be   : > { %v1219_v35 = vpop.eup %1218 }
 0x3bf   : > { %v1221_v36 = vpop.eup %1220  ;;  %v857_v37 = vadd.f32 1.0, %v1219_v35 }
 0x3c0   : > { %v858_v38 = vadd.f32 1.0, %v1221_v36 }
 0x3c1   : > { %1222 = vrcp.f32 %v857_v37 }
 0x3c2   : > { %1224 = vrcp.f32 %v858_v38 }
 0x3cb   : > { %v1223_v42 = vpop.eup %1222 }
 0x3cc   : > { %v1225_v44 = vpop.eup %1224 }
 0x3cd   : > { %v865_v45 = vcombine.low %v1223_v42, %v1225_v44 }
 0x3cf   : > { %v872_v46 = vrot.slane %v865_v45, %v871_v43 }
 0x3d1   : > { %v879_v47 = vrot.slane %v872_v46, %v871_v43 }
 0x3d3   : > { %885 = vst.msk [vmem:[%s454_s27] sm:$0x3] %vm883_vm2, %v879_v47 }
 0x3d4   : > { %1465 = shalt.err (!%p1462_p10)
}
 0x3d5   : > { %s1466_s22 = scalar_lea.hbm %s1943_s30, 32  ;;  %s1470_s19 = scalar_lea.hbm %s1996_s9, 64 }
 0x3d6   : > { %p1467_p11 = scmp.ne.s32.totalorder %s1943_s30, %s1466_s22  ;;  %p1471_p9 = scmp.lt.u32.totalorder %s1943_s30, %s1996_s9 }
 0x3d7   : > { %p1472_p7 = scmp.lt.u32.totalorder %s1470_s19, %s1466_s22  ;;  %p1474_p12 = scmp.lt.u32.totalorder %s1466_s22, %s1943_s30 }
 0x3d8   : > { %p1468_p3 = pnand %p1467_p11, %p2017_p1 }
 0x3d9   : > { %p1473_p4 = por %p1472_p7, %p1471_p9 }
 0x3da   : > { %p1469_p5 = pneg %p1468_p3 }
 0x3db   : > { %p1475_p13 = por %p1474_p12, %p1473_p4 }
 0x3dd   : > { %p1476_p0 = pnand %p1475_p13, %p1469_p5 }
 0x3df   : > { %1479 = shalt.err (!%p1476_p0)
}
 0x3e0   : > { %1114 = dma.vmem_to_hbm [thread:$0]  (%p2017_p1), %s1945_s23, 32, %s1943_s30, %s887_s24  }
 0x3e1 PF: > { %s913_s26 = sand.u32 1, %s1522_s11   ;;  %p2018_p2 = scmp.ne.s32.totalorder %s2006_s29, 0 }
 0x3e2   : > { %p2019_p8 = scmp.ge.s32.totalorder %s1534_s14, 2  ;;  %s914_s21 = scalar_lea.sflag [#allocation5], %s913_s26 }
 0x3e4   : > { %p1143_p6 = pnand %p2019_p8, %p2018_p2 }
 0x3e6   : > { %1517 = dma.done.wait (!%p1143_p6), %s914_s21, 32  }
 0x3e7   : > { %1519 = vsyncadd (!%p1143_p6), %s914_s21, 4294967264  ;;  %p28_p10 = scmp.ge.s32.totalorder %s1829_s28, 4   ;;  %s2020_s11 = smov %s1526_s12 }
 0x3e8   : > { %s2021_s12 = smov %s1530_s13  ;;  %s2022_s13 = smov %s1841_s10 }
 0x3e9   : > { %s2023_s14 = smov %s1829_s28  ;;  %30 = sbr.rel (!%p28_p10) target bundleno = 12 (0xc), region = 129 }
 0x3f0   :  { %919 = vsyncpa [#allocation4], 1 }
 0x3f1   :  { %921 = vsyncpa [#allocation4 + $0x1], 1 }
 0x3f2   :  { %922 = vsyncpa [#allocation7], 1 }
 0x3f3   :  { %923 = vsyncpa [#allocation10], 1 }
 0x3f4   :  { %924 = vsyncpa [#allocation13], 1 }
 0x3f5   :  { %925 = vsyncpa [#allocation16], 1 }
 0x3f6   :  { %926 = vsyncpa [#allocation5], 1 }
 0x3f7   :  { %928 = vsyncpa [#allocation5 + $0x1], 1 }

</bundles_post_ra>
